<compile_context>
chip_gen: v7x
topology: tpu7x:2x2x1
jax: 0.10.0
libtpu: 0.0.40
codegen_flags: <defaults>
</compile_context>

<pallas_src>
import jax
import jax.numpy as jnp
from jax.experimental import pallas as pl
from jax.experimental.pallas import tpu as pltpu

CONTEXT_SIZE = 2
EMBEDDING_DIM = 10
HIDDEN = 128

_SUBLANE = 8
_LANE = 128
_MAX_BATCH_TILE = 128     # raise to 256-512 on v6e/v7x for very large batches
_MAX_VOCAB_TILE = 1024    # lane-dense output tile (multiple of 128)


def _round_up(x, m):
    return ((x + m - 1) // m) * m


def _pad_to(x, target, axis):
    pad = target - x.shape[axis]
    if pad <= 0:
        return x
    widths = [(0, 0)] * x.ndim
    widths[axis] = (0, pad)
    return jnp.pad(x, widths)


def ngram_kernel(idx_ref, t_ref, w2_ref, b2_ref, out_ref, h_ref):
    """One (batch-tile, vocab-tile) block of the NGram forward.

    idx_ref : VMEM (C, BT, 1) int32   token ids for this batch tile.
    t_ref   : VMEM (C, Vg, H)         folded tables T[c] = emb @ W1_c (b1 in T[0]).
    w2_ref  : VMEM (H, TN)            layer-2 weight, current vocab tile.
    b2_ref  : VMEM (1, TN)
    out_ref : VMEM (BT, TN)           logits block (lane-dense, unmasked stores).
    h_ref   : VMEM (BT, H) scratch    hidden activations, computed once per batch
                                      tile (at vocab-tile index 0), reused across
                                      all vocab tiles.
    """
    c_size, vg, hidden = t_ref.shape
    bt = out_ref.shape[0]

    @pl.when(pl.program_id(1) == 0)
    def _compute_hidden():
        lane = jax.lax.broadcasted_iota(jnp.int32, (bt, vg), 1)
        acc = jnp.zeros((bt, hidden), jnp.float32)
        for c in range(c_size):                                  # static unroll (C = 2)
            one_hot = (lane == idx_ref[c]).astype(jnp.float32)   # (BT, Vg)
            acc = acc + jnp.dot(one_hot, t_ref[c],
                                preferred_element_type=jnp.float32)
        h_ref[...] = jnp.maximum(acc, 0.0)                       # b1 already folded in

    out_ref[...] = (
        jnp.dot(h_ref[...], w2_ref[...], preferred_element_type=jnp.float32)
        + b2_ref[...])


def ngram_forward_batched(token_ids, emb, w1, b1, w2, b2):
    """token_ids: (B, CONTEXT_SIZE) int  ->  logits (B, V) float32."""
    B, C = token_ids.shape
    V, D = emb.shape
    H = w1.shape[1]
    assert w1.shape[0] == C * D

    # Fold the embedding table through layer 1 (wrapper-side, negligible cost):
    #   T[c] = emb @ W1[c*D:(c+1)*D, :]   (V, H);  b1 folded into T[0].
    emb_f = emb.astype(jnp.float32)
    w1_f = w1.astype(jnp.float32).reshape(C, D, H)
    t = jnp.einsum("vd,cdh->cvh", emb_f, w1_f)
    t = t.at[0].add(b1.astype(jnp.float32).reshape(1, H))

    BT = min(_MAX_BATCH_TILE, _round_up(B, _SUBLANE))
    Bp = _round_up(B, BT)
    Vg = _round_up(V, _LANE)                      # one-hot / gather lane width
    TN = min(_MAX_VOCAB_TILE, _round_up(V, _LANE))
    Vp = _round_up(V, TN)                         # lane-dense tiled output vocab

    # Token ids as (C, Bp, 1): tiny VMEM input, no 2-D SMEM padding blow-up.
    ids_p = _pad_to(token_ids.astype(jnp.int32), Bp, 0)           # (Bp, C)
    ids_p = ids_p.T[:, :, None]                                   # (C, Bp, 1)
    t_p = _pad_to(t, Vg, 1)                                       # (C, Vg, H)
    w2_p = _pad_to(w2.astype(jnp.float32), Vp, 1)                 # (H, Vp)
    b2_p = _pad_to(b2.astype(jnp.float32).reshape(1, V), Vp, 1)   # (1, Vp)

    grid = (Bp // BT, Vp // TN)     # batch axis "parallel", vocab axis "arbitrary"

    flops = 2 * Bp * Vg * H * C + 2 * Bp * H * Vp
    bytes_accessed = 4 * (ids_p.size + t_p.size + w2_p.size + b2_p.size + Bp * Vp)

    # NOTE: the folded tables (C, Vg, H) stay whole-array resident here (fine for
    # the small vocab of this module); for very large vocabularies tile the gather
    # contraction as well (or jnp.take the rows in the wrapper) and cast the
    # weights to bf16 on v6e/v7x.
    out = pl.pallas_call(
        ngram_kernel,
        out_shape=jax.ShapeDtypeStruct((Bp, Vp), jnp.float32),
        grid_spec=pltpu.PrefetchScalarGridSpec(
            num_scalar_prefetch=0,
            grid=grid,
            in_specs=[
                pl.BlockSpec((C, BT, 1), lambda i, j: (0, i, 0)),
                pl.BlockSpec((C, Vg, H), lambda i, j: (0, 0, 0)),
                pl.BlockSpec((H, TN),    lambda i, j: (0, j)),
                pl.BlockSpec((1, TN),    lambda i, j: (0, j)),
            ],
            out_specs=pl.BlockSpec((BT, TN), lambda i, j: (i, j)),
            scratch_shapes=[pltpu.VMEM((BT, H), jnp.float32)],
        ),
        compiler_params=pltpu.CompilerParams(
            dimension_semantics=("parallel", "arbitrary"),
            vmem_limit_bytes=32 * 1024 * 1024),
        cost_estimate=pl.CostEstimate(
            flops=flops, transcendentals=0, bytes_accessed=bytes_accessed),
    )(ids_p, t_p, w2_p, b2_p)

    return out[:B, :V]


def ngram_forward(token_ids, emb, w1, b1, w2, b2):
    """Exact NGramLM.forward semantics: (CONTEXT_SIZE,) ids -> (1, V) logits."""
    return ngram_forward_batched(token_ids.reshape(1, CONTEXT_SIZE),
                                 emb, w1, b1, w2, b2)


if __name__ == "__main__":
    VOCAB_SIZE = 20    # len(vocab) of the test sentence in the reference script
    BATCH = 256        # context windows in the batched demo (2 batch grid steps)

    key = jax.random.PRNGKey(0)
    k_emb, k_w1, k_b1, k_w2, k_b2, k_idx = jax.random.split(key, 6)

    emb = jax.random.normal(k_emb, (VOCAB_SIZE, EMBEDDING_DIM), jnp.float32)
    # Linear weights stored pre-transposed: (in_features, out_features).
    w1 = jax.random.normal(k_w1, (CONTEXT_SIZE * EMBEDDING_DIM, HIDDEN),
                           jnp.float32) * 0.1
    b1 = jax.random.normal(k_b1, (HIDDEN,), jnp.float32) * 0.1
    w2 = jax.random.normal(k_w2, (HIDDEN, VOCAB_SIZE), jnp.float32) * 0.1
    b2 = jax.random.normal(k_b2, (VOCAB_SIZE,), jnp.float32) * 0.1

    def reference(ids_2d):
        x = emb[ids_2d].reshape(ids_2d.shape[0], -1)
        h = jnp.maximum(x @ w1 + b1, 0.0)
        return h @ w2 + b2

    # --- Original module semantics: one context window -> (1, V) logits. ---
    token_ids = jax.random.randint(k_idx, (CONTEXT_SIZE,), 0, VOCAB_SIZE,
                                   dtype=jnp.int32)
    logits = jax.block_until_ready(ngram_forward(token_ids, emb, w1, b1, w2, b2))
    assert logits.shape == (1, VOCAB_SIZE)
    assert jnp.allclose(logits, reference(token_ids.reshape(1, -1)),
                        atol=1e-4, rtol=1e-4)

    # --- Batched path (fills MXU sublanes, amortizes per-step overhead). ---
    batch_ids = jax.random.randint(k_idx, (BATCH, CONTEXT_SIZE), 0, VOCAB_SIZE,
                                   dtype=jnp.int32)
    batch_logits = jax.block_until_ready(
        ngram_forward_batched(batch_ids, emb, w1, b1, w2, b2))
    assert batch_logits.shape == (BATCH, VOCAB_SIZE)
    assert jnp.allclose(batch_logits, reference(batch_ids), atol=1e-4, rtol=1e-4)

    print("KERNEL_OK")
</pallas_src>

<mosaic_0001>
module attributes {stable_mosaic.version = 11 : i64} {
  func.func @ngram_kernel(%arg0: i32, %arg1: i32, %arg2: memref<2x8x1xi32, #tpu.memory_space<vmem>>, %arg3: memref<2x128x128xf32, #tpu.memory_space<vmem>>, %arg4: memref<128x128xf32, #tpu.memory_space<vmem>>, %arg5: memref<1x128xf32, #tpu.memory_space<vmem>>, %arg6: memref<8x128xf32, #tpu.memory_space<vmem>>, %arg7: memref<8x128xf32, #tpu.memory_space<vmem>>) attributes {dimension_semantics = [#tpu.dimension_semantics<parallel>, #tpu.dimension_semantics<arbitrary>], iteration_bounds = array<i64: 1, 1>, scalar_prefetch = 0 : i64, scratch_operands = 1 : i64, tpu.core_type = #tpu.core_type<tc>, window_params = [{transform_indices = @transform_0, window_bounds = array<i64: 2, 8, 1>}, {pipeline_mode = #tpu.pipeline_mode<synchronous>, transform_indices = @transform_1, window_bounds = array<i64: 2, 128, 128>}, {transform_indices = @transform_2, window_bounds = array<i64: 128, 128>}, {transform_indices = @transform_3, window_bounds = array<i64: 1, 128>}, {transform_indices = @transform_4, window_bounds = array<i64: 8, 128>}]} {
    %c0_i32 = arith.constant 0 : i32
    %0 = arith.cmpi eq, %arg1, %c0_i32 : i32
    %1 = arith.extui %0 : i1 to i32
    %c0_i32_0 = arith.constant 0 : i32
    %2 = arith.cmpi ne, %1, %c0_i32_0 : i32
    scf.if %2 {
      %10 = tpu.iota {dimensions = array<i32: 1>} : vector<8x128xi32>
      %cst_8 = arith.constant 0.000000e+00 : f32
      %11 = vector.broadcast %cst_8 : f32 to vector<8x128xf32>
      %c0_9 = arith.constant 0 : index
      %c0_10 = arith.constant 0 : index
      %c0_11 = arith.constant 0 : index
      %12 = vector.load %arg2[%c0_9, %c0_10, %c0_11] : memref<2x8x1xi32, #tpu.memory_space<vmem>>, vector<1x8x1xi32>
      %13 = vector.shape_cast %12 : vector<1x8x1xi32> to vector<8x1xi32>
      %14 = vector.broadcast %13 : vector<8x1xi32> to vector<8x128xi32>
      %15 = arith.cmpi eq, %10, %14 : vector<8x128xi32>
      %16 = arith.extui %15 : vector<8x128xi1> to vector<8x128xi32>
      %17 = arith.sitofp %16 : vector<8x128xi32> to vector<8x128xf32>
      %c0_12 = arith.constant 0 : index
      %c0_13 = arith.constant 0 : index
      %c0_14 = arith.constant 0 : index
      %18 = vector.load %arg3[%c0_12, %c0_13, %c0_14] : memref<2x128x128xf32, #tpu.memory_space<vmem>>, vector<1x128x128xf32>
      %19 = vector.shape_cast %18 : vector<1x128x128xf32> to vector<128x128xf32>
      %cst_15 = arith.constant dense<0.000000e+00> : vector<8x128xf32>
      %20 = tpu.matmul %17, %19, %cst_15 {dimension_numbers = #tpu.dot_dimension_numbers<[1], [0], [0], [1], [0, 0, 1, 1], [], []>} : vector<8x128xf32>, vector<128x128xf32>, vector<8x128xf32> -> vector<8x128xf32>
      %21 = arith.addf %11, %20 : vector<8x128xf32>
      %c1 = arith.constant 1 : index
      %c0_16 = arith.constant 0 : index
      %c0_17 = arith.constant 0 : index
      %22 = vector.load %arg2[%c1, %c0_16, %c0_17] : memref<2x8x1xi32, #tpu.memory_space<vmem>>, vector<1x8x1xi32>
      %23 = vector.shape_cast %22 : vector<1x8x1xi32> to vector<8x1xi32>
      %24 = vector.broadcast %23 : vector<8x1xi32> to vector<8x128xi32>
      %25 = arith.cmpi eq, %10, %24 : vector<8x128xi32>
      %26 = arith.extui %25 : vector<8x128xi1> to vector<8x128xi32>
      %27 = arith.sitofp %26 : vector<8x128xi32> to vector<8x128xf32>
      %c1_18 = arith.constant 1 : index
      %c0_19 = arith.constant 0 : index
      %c0_20 = arith.constant 0 : index
      %28 = vector.load %arg3[%c1_18, %c0_19, %c0_20] : memref<2x128x128xf32, #tpu.memory_space<vmem>>, vector<1x128x128xf32>
      %29 = vector.shape_cast %28 : vector<1x128x128xf32> to vector<128x128xf32>
      %cst_21 = arith.constant dense<0.000000e+00> : vector<8x128xf32>
      %30 = tpu.matmul %27, %29, %cst_21 {dimension_numbers = #tpu.dot_dimension_numbers<[1], [0], [0], [1], [0, 0, 1, 1], [], []>} : vector<8x128xf32>, vector<128x128xf32>, vector<8x128xf32> -> vector<8x128xf32>
      %31 = arith.addf %21, %30 : vector<8x128xf32>
      %cst_22 = arith.constant 0.000000e+00 : f32
      %32 = vector.broadcast %cst_22 : f32 to vector<8x128xf32>
      %33 = arith.maximumf %31, %32 : vector<8x128xf32>
      %c0_23 = arith.constant 0 : index
      %c0_24 = arith.constant 0 : index
      %34 = vector.load %arg7[%c0_23, %c0_24] : memref<8x128xf32, #tpu.memory_space<vmem>>, vector<8x128xf32>
      tpu.vector_store %arg7[%c0_23, %c0_24], %33 {strides = array<i32>} : memref<8x128xf32, #tpu.memory_space<vmem>>, vector<8x128xf32>,
    } else {
    }
    %c0 = arith.constant 0 : index
    %c0_1 = arith.constant 0 : index
    %3 = vector.load %arg7[%c0, %c0_1] : memref<8x128xf32, #tpu.memory_space<vmem>>, vector<8x128xf32>
    %c0_2 = arith.constant 0 : index
    %c0_3 = arith.constant 0 : index
    %4 = vector.load %arg4[%c0_2, %c0_3] : memref<128x128xf32, #tpu.memory_space<vmem>>, vector<128x128xf32>
    %cst = arith.constant dense<0.000000e+00> : vector<8x128xf32>
    %5 = tpu.matmul %3, %4, %cst {dimension_numbers = #tpu.dot_dimension_numbers<[1], [0], [0], [1], [0, 0, 1, 1], [], []>} : vector<8x128xf32>, vector<128x128xf32>, vector<8x128xf32> -> vector<8x128xf32>
    %c0_4 = arith.constant 0 : index
    %c0_5 = arith.constant 0 : index
    %6 = vector.load %arg5[%c0_4, %c0_5] : memref<1x128xf32, #tpu.memory_space<vmem>>, vector<1x128xf32>
    %7 = vector.broadcast %6 : vector<1x128xf32> to vector<8x128xf32>
    %8 = arith.addf %5, %7 : vector<8x128xf32>
    %c0_6 = arith.constant 0 : index
    %c0_7 = arith.constant 0 : index
    %9 = vector.load %arg6[%c0_6, %c0_7] : memref<8x128xf32, #tpu.memory_space<vmem>>, vector<8x128xf32>
    tpu.vector_store %arg6[%c0_6, %c0_7], %8 {strides = array<i32>} : memref<8x128xf32, #tpu.memory_space<vmem>>, vector<8x128xf32>,
    return
  }
  func.func @transform_0(%arg0: i32, %arg1: i32) -> (i32, i32, i32) {
    %c0_i32 = arith.constant 0 : i32
    %c0_i32_0 = arith.constant 0 : i32
    %c0_i32_1 = arith.constant 0 : i32
    return %c0_i32, %arg0, %c0_i32_0 : i32, i32, i32
  }
  func.func @transform_1(%arg0: i32, %arg1: i32) -> (i32, i32, i32) {
    %c0_i32 = arith.constant 0 : i32
    %c0_i32_0 = arith.constant 0 : i32
    %c0_i32_1 = arith.constant 0 : i32
    %c0_i32_2 = arith.constant 0 : i32
    return %c0_i32, %c0_i32_0, %c0_i32_1 : i32, i32, i32
  }
  func.func @transform_2(%arg0: i32, %arg1: i32) -> (i32, i32) {
    %c0_i32 = arith.constant 0 : i32
    %c0_i32_0 = arith.constant 0 : i32
    return %c0_i32, %arg1 : i32, i32
  }
  func.func @transform_3(%arg0: i32, %arg1: i32) -> (i32, i32) {
    %c0_i32 = arith.constant 0 : i32
    %c0_i32_0 = arith.constant 0 : i32
    return %c0_i32, %arg1 : i32, i32
  }
  func.func @transform_4(%arg0: i32, %arg1: i32) -> (i32, i32) {
    %c0_i32 = arith.constant 0 : i32
    return %arg0, %arg1 : i32, i32
  }
}

</mosaic_0001>

<bundles_post_ra>
// kernel: tpu_custom_call.1
= control target key start
LH: loop header
LB: loop body
LE: loop exit
PB: predicated region body
PF: predicated region fallthrough
CT: control target
= control target key end

     0   :  { %9 = vsyncpa [#allocation4], 0  ;;  %s782_s0 = inlined_call_operand.vmem [shape: s32[2,8,1], index: 0, kind: input, shape index: {}]   ;;  %s783_s1 = inlined_call_operand.hbm [shape: f32[2,128,128], index: 1, kind: input, shape index: {}]   ;;  %s784_s2 = inlined_call_operand.hbm [shape: f32[128,128], index: 2, kind: input, shape index: {}]   ;;  %s785_s3 = inlined_call_operand.vmem [shape: f32[1,128], index: 3, kind: input, shape index: {}]   ;;  %s786_s4 = inlined_call_operand.hbm [shape: f32[8,128], index: 4, kind: output, shape index: {}]  }
   0x1   :  { %10 = vsyncpa [#allocation7], 0 }
   0x2   :  { %11 = vsyncpa [#allocation5], 0  ;;  %s672_s15 = smov [#allocation3]   ;;  %s600_s19 = scalar_lea.hbm %s783_s1, 4096 }
   0x3   :  { %s19_s16 = sshll.u32 %s672_s15, 4  ;;  %p601_p0 = scmp.ne.s32.totalorder %s783_s1, %s600_s19  ;;  %s20_s16 = int_to_ptr.vmem [resolvable:$true] %s19_s16 }
   0x4   :  { %p604_p1 = scmp.lt.u32.totalorder %s600_s19, %s783_s1 }
   0x6   :  { %p606_p2 = pnand %p604_p1, %p601_p0 }
   0x8   :  { %609 = shalt.err (!%p606_p2)
}
   0x9   :  { %s610_s24 = scalar_lea.vmem %s20_s16, 4096  ;;  %p615_p4 = scmp.lt.s32.totalorder %s20_s16, %s20_s16 }
   0xa   :  { %p611_p3 = scmp.ne.s32.totalorder %s20_s16, %s610_s24  ;;  %p616_p5 = scmp.lt.s32.totalorder %s610_s24, %s610_s24 }
   0xc   :  { %p617_p6 = por %p616_p5, %p615_p4 }
   0xe   :  { %p618_p7 = pnand %p617_p6, %p611_p3 }
  0x10   :  { %621 = shalt.err (!%p618_p7)
}
  0x11   :  { %s673_s25 = smov 128   ;;  %s674_s26 = smov 8  }
  0x12   :  { %25 = dma.hbm_to_vmem [thread:$0]  %s783_s1, 4096, %s20_s16, [#allocation4], %s673_s25, %s673_s25, %s674_s26  }
  0x13   :  { %s675_s29 = smov [#allocation6]   ;;  %s622_s7 = scalar_lea.hbm %s784_s2, 2048 }
  0x14   :  { %s31_s30 = sshll.u32 %s675_s29, 4  ;;  %p623_p8 = scmp.ne.s32.totalorder %s784_s2, %s622_s7  ;;  %s32_s30 = int_to_ptr.vmem [resolvable:$true] %s31_s30 }
  0x15   :  { %p626_p9 = scmp.lt.u32.totalorder %s622_s7, %s784_s2 }
  0x17   :  { %p628_p10 = pnand %p626_p9, %p623_p8 }
  0x19   :  { %631 = shalt.err (!%p628_p10)
}
  0x1a   :  { %s632_s12 = scalar_lea.vmem %s32_s30, 2048  ;;  %p637_p12 = scmp.lt.s32.totalorder %s32_s30, %s32_s30 }
  0x1b   :  { %p633_p11 = scmp.ne.s32.totalorder %s32_s30, %s632_s12  ;;  %p638_p13 = scmp.lt.s32.totalorder %s632_s12, %s632_s12 }
  0x1d   :  { %p639_p0 = por %p638_p13, %p637_p12 }
  0x1f   :  { %p640_p1 = pnand %p639_p0, %p633_p11 }
  0x21   :  { %643 = shalt.err (!%p640_p1)
}
  0x22   :  { %37 = dma.hbm_to_vmem [thread:$0]  %s784_s2, 2048, %s32_s30, [#allocation7], %s673_s25, %s673_s25, %s674_s26  }
  0x23   :  { %666 = dma.done.wait [#allocation4], 4096  }
  0x24   :  { %667 = vsyncadd [#allocation4], 4294963200 }
  0x25   :  { %668 = dma.done.wait [#allocation7], 2048  }
  0x26   :  { %669 = vsyncadd [#allocation7], 4294965248  ;;  %v676_v0 = vmov 0   ;;  %v677_v1 = vmov 0.0|0.0   ;;  %v354_v2 = vld [vmem:[%s782_s0 + $0x8] sm:$0xff]  ;;  %v84_v3 = vld [vmem:[#allocation3 + $0x80] sm:$0xff]  ;;  %v50_v50 = vlaneseq }
  0x27   :  { %599 = vset.pattern.permute.xlu0 %v676_v0  ;;  %515 = vmatprep.subr.bf16.mxu0 %v677_v1  ;;  %v85_v4 = vld [vmem:[#allocation3 + $0x88] sm:$0xff]  ;;  %v86_v5 = vld [vmem:[#allocation3 + $0x90] sm:$0xff]  ;;  %v87_v6 = vld [vmem:[#allocation3 + $0x98] sm:$0xff]  ;;  %vm678_vm0 = vmmov 0   ;;  %v679_v7 = vmov 0.0   ;;  %v680_v58 = vmov 1.0  }
  0x28   :  { %563 = vmatprep.subr.bf16.mxu1 %v677_v1  ;;  %78 = vperm.xlu0 %599, %v354_v2   ;;  %v52_v8 = vld [vmem:[%s782_s0] sm:$0xff]  ;;  %v516_v9 = vpack.c.bf16 %v85_v4, %v84_v3  ;;  %v519_v10 = vpack.c.bf16 %v87_v6, %v86_v5  ;;  %v88_v11 = vld [vmem:[#allocation3 + $0xa0] sm:$0xff]  ;;  %v89_v12 = vld [vmem:[#allocation3 + $0xa8] sm:$0xff]  ;;  %v51_v53 = vand.u32 127, %v50_v50  ;;  %s681_s18 = smov [#allocation8]  }
  0x29   :  { %442 = vmatprep.mubr.msk.f32.mxu0 %vm678_vm0, %v679_v7  ;;  %512 = vmatprep.mubr.msk.f32.mxu1 %vm678_vm0, %v679_v7  ;;  %v522_v13 = vpack.c.bf16 %v89_v12, %v88_v11  ;;  %v90_v14 = vld [vmem:[#allocation3 + $0xb0] sm:$0xff]  ;;  %v91_v15 = vld [vmem:[#allocation3 + $0xb8] sm:$0xff]  ;;  %v92_v17 = vld [vmem:[#allocation3 + $0xc0] sm:$0xff]  ;;  %s343_s19 = sshll.u32 %s681_s18, 4  ;;  %s344_s19 = int_to_ptr.vmem [resolvable:$true] %s343_s19 }
  0x2a   :  { %517 = vmatpush3.bf16.msra.mxu0 %v516_v9  ;;  %v525_v16 = vpack.c.bf16 %v91_v15, %v90_v14  ;;  %v93_v18 = vld [vmem:[#allocation3 + $0xc8] sm:$0xff]  ;;  %v94_v20 = vld [vmem:[#allocation3 + $0xd0] sm:$0xff]  ;;  %v95_v21 = vld [vmem:[#allocation3 + $0xd8] sm:$0xff]  ;;  %s644_s20 = scalar_lea.vmem %s344_s19, 128  ;;  %p649_p3 = scmp.lt.s32.totalorder %s344_s19, %s344_s19 }
  0x2b   :  { %518 = vmatprep.subr.bf16.mxu0 %v677_v1  ;;  %v528_v19 = vpack.c.bf16 %v93_v18, %v92_v17  ;;  %v531_v22 = vpack.c.bf16 %v95_v21, %v94_v20  ;;  %v96_v23 = vld [vmem:[#allocation3 + $0xe0] sm:$0xff]  ;;  %v97_v24 = vld [vmem:[#allocation3 + $0xe8] sm:$0xff]  ;;  %v98_v26 = vld [vmem:[#allocation3 + $0xf0] sm:$0xff]  ;;  %p645_p2 = scmp.ne.s32.totalorder %s344_s19, %s644_s20  ;;  %p650_p4 = scmp.lt.s32.totalorder %s644_s20, %s644_s20 }
  0x2c   :  { %54 = vperm.xlu0 %599, %v52_v8   ;;  %v534_v25 = vpack.c.bf16 %v97_v24, %v96_v23  ;;  %v99_v27 = vld [vmem:[#allocation3 + $0xf8] sm:$0xff]  ;;  %v243_v29 = vld [vmem:[#allocation6] sm:$0xff]  ;;  %v244_v30 = vld [vmem:[#allocation6 + $0x8] sm:$0xff] }
  0x2d   :  { %v537_v28 = vpack.c.bf16 %v99_v27, %v98_v26  ;;  %v245_v31 = vld [vmem:[#allocation6 + $0x10] sm:$0xff]  ;;  %v564_v32 = vpack.c.bf16 %v244_v30, %v243_v29  ;;  %v246_v33 = vld [vmem:[#allocation6 + $0x18] sm:$0xff]  ;;  %v247_v35 = vld [vmem:[#allocation6 + $0x20] sm:$0xff]  ;;  %p651_p5 = por %p650_p4, %p649_p3 }
  0x2e   :  { %520 = vmatpush3.bf16.msra.mxu0 %v519_v10  ;;  %v567_v34 = vpack.c.bf16 %v246_v33, %v245_v31  ;;  %v248_v36 = vld [vmem:[#allocation6 + $0x28] sm:$0xff]  ;;  %v249_v38 = vld [vmem:[#allocation6 + $0x30] sm:$0xff]  ;;  %v250_v39 = vld [vmem:[#allocation6 + $0x38] sm:$0xff] }
  0x2f   :  { %521 = vmatprep.subr.bf16.mxu0 %v677_v1  ;;  %565 = vmatpush3.bf16.msra.mxu1 %v564_v32  ;;  %v570_v37 = vpack.c.bf16 %v248_v36, %v247_v35  ;;  %v573_v40 = vpack.c.bf16 %v250_v39, %v249_v38  ;;  %v251_v41 = vld [vmem:[#allocation6 + $0x40] sm:$0xff]  ;;  %v252_v42 = vld [vmem:[#allocation6 + $0x48] sm:$0xff]  ;;  %v253_v44 = vld [vmem:[#allocation6 + $0x50] sm:$0xff]  ;;  %p652_p6 = pnand %p651_p5, %p645_p2 }
  0x30   :  { %566 = vmatprep.subr.bf16.mxu1 %v677_v1  ;;  %v576_v43 = vpack.c.bf16 %v252_v42, %v251_v41  ;;  %v254_v45 = vld [vmem:[#allocation6 + $0x58] sm:$0xff]  ;;  %v255_v47 = vld [vmem:[#allocation6 + $0x60] sm:$0xff]  ;;  %v256_v48 = vld [vmem:[#allocation6 + $0x68] sm:$0xff] }
  0x31   :  { %v579_v46 = vpack.c.bf16 %v254_v45, %v253_v44  ;;  %v582_v49 = vpack.c.bf16 %v256_v48, %v255_v47  ;;  %v59_v51 = vld [vmem:[#allocation3] sm:$0xff]  ;;  %v60_v52 = vld [vmem:[#allocation3 + $0x8] sm:$0xff]  ;;  %v61_v56 = vld [vmem:[#allocation3 + $0x10] sm:$0xff] }
  0x32   :  { %523 = vmatpush3.bf16.msra.mxu0 %v522_v13  ;;  %v540_v54 = vpack.c.bf16 %v60_v52, %v59_v51  ;;  %v62_v57 = vld [vmem:[#allocation3 + $0x18] sm:$0xff]  ;;  %v63_v60 = vld [vmem:[#allocation3 + $0x20] sm:$0xff]  ;;  %v64_v61 = vld [vmem:[#allocation3 + $0x28] sm:$0xff] }
  0x33   :  { %524 = vmatprep.subr.bf16.mxu0 %v677_v1  ;;  %568 = vmatpush3.bf16.msra.mxu1 %v567_v34  ;;  %v543_v59 = vpack.c.bf16 %v62_v57, %v61_v56  ;;  %v546_v62 = vpack.c.bf16 %v64_v61, %v63_v60  ;;  %v65_v63 = vld [vmem:[#allocation3 + $0x30] sm:$0xff]  ;;  %v66_v0 = vld [vmem:[#allocation3 + $0x38] sm:$0xff]  ;;  %v67_v3 = vld [vmem:[#allocation3 + $0x40] sm:$0xff] }
  0x34   :  { %569 = vmatprep.subr.bf16.mxu1 %v677_v1  ;;  %v549_v2 = vpack.c.bf16 %v66_v0, %v65_v63  ;;  %v68_v4 = vld [vmem:[#allocation3 + $0x48] sm:$0xff]  ;;  %v69_v6 = vld [vmem:[#allocation3 + $0x50] sm:$0xff]  ;;  %v71_v9 = vld [vmem:[#allocation3 + $0x60] sm:$0xff] }
  0x35   :  { %v552_v5 = vpack.c.bf16 %v68_v4, %v67_v3  ;;  %v72_v10 = vld [vmem:[#allocation3 + $0x68] sm:$0xff]  ;;  %v73_v12 = vld [vmem:[#allocation3 + $0x70] sm:$0xff]  ;;  %v74_v13 = vld [vmem:[#allocation3 + $0x78] sm:$0xff] }
  0x36   :  { %526 = vmatpush3.bf16.msra.mxu0 %v525_v16  ;;  %v558_v11 = vpack.c.bf16 %v72_v10, %v71_v9  ;;  %v561_v14 = vpack.c.bf16 %v74_v13, %v73_v12  ;;  %v257_v16 = vld [vmem:[#allocation6 + $0x70] sm:$0xff]  ;;  %v258_v17 = vld [vmem:[#allocation6 + $0x78] sm:$0xff] }
  0x37   :  { %527 = vmatprep.subr.bf16.mxu0 %v677_v1  ;;  %571 = vmatpush3.bf16.msra.mxu1 %v570_v37  ;;  %v585_v18 = vpack.c.bf16 %v258_v17, %v257_v16 }
  0x38   :  { %572 = vmatprep.subr.bf16.mxu1 %v677_v1 }
  0x3a   :  { %529 = vmatpush3.bf16.msra.mxu0 %v528_v19 }
  0x3b   :  { %530 = vmatprep.subr.bf16.mxu0 %v677_v1  ;;  %574 = vmatpush3.bf16.msra.mxu1 %v573_v40 }
  0x3c   :  { %575 = vmatprep.subr.bf16.mxu1 %v677_v1 }
  0x3e   :  { %532 = vmatpush3.bf16.msra.mxu0 %v531_v22  ;;  %v358_v22 = vld [vmem:[%s785_s3] ss:$0 sm:$0xff] }
  0x3f   :  { %533 = vmatprep.subr.bf16.mxu0 %v677_v1  ;;  %577 = vmatpush3.bf16.msra.mxu1 %v576_v43 }
  0x40   :  { %578 = vmatprep.subr.bf16.mxu1 %v677_v1 }
  0x42   :  { %535 = vmatpush3.bf16.msra.mxu0 %v534_v25 }
  0x43   :  { %536 = vmatprep.subr.bf16.mxu0 %v677_v1  ;;  %580 = vmatpush3.bf16.msra.mxu1 %v579_v46 }
  0x44   :  { %581 = vmatprep.subr.bf16.mxu1 %v677_v1 }
  0x46   :  { %538 = vmatpush3.bf16.msra.mxu0 %v537_v28 }
  0x47   :  { %539 = vmatprep.subr.bf16.mxu0 %v677_v1  ;;  %583 = vmatpush3.bf16.msra.mxu1 %v582_v49 }
  0x48   :  { %584 = vmatprep.subr.bf16.mxu1 %v677_v1 }
  0x4b   :  { %586 = vmatpush3.bf16.msra.mxu1 %v585_v18 }
  0xa7   :  { %v79_v55 = vpop.permute.xlu0 %78 }
  0xa8   :  { %vm80_vm1 = vcmp.eq.s32.totalorder %v51_v53, %v79_v55 }
  0xa9   :  { %443 = vmatmul.mubr.msk.f32.vlgmr.msra.gmra.mrb[0].mxu0 %vm80_vm1, %v680_v58 }
  0xaa   :  { %541 = vmatpush3.bf16.msra.mxu0 %v540_v54  ;;  %477 = vmatprep.mubr.msk.f32.mxu0 %vm678_vm0, %v679_v7  ;;  %v70_v7 = vld [vmem:[#allocation3 + $0x58] sm:$0xff] }
  0xab   :  { %542 = vmatprep.subr.bf16.mxu0 %v677_v1  ;;  %v555_v8 = vpack.c.bf16 %v70_v7, %v69_v6  ;;  %v55_v15 = vpop.permute.xlu0 %54 }
  0xac   :  { %vm56_vm2 = vcmp.eq.s32.totalorder %v51_v53, %v55_v15 }
  0xae   :  { %544 = vmatpush3.bf16.msra.mxu0 %v543_v59 }
  0xaf   :  { %545 = vmatprep.subr.bf16.mxu0 %v677_v1 }
  0xb2   :  { %547 = vmatpush3.bf16.msra.mxu0 %v546_v62 }
  0xb3   :  { %548 = vmatprep.subr.bf16.mxu0 %v677_v1 }
  0xb6   :  { %550 = vmatpush3.bf16.msra.mxu0 %v549_v2 }
  0xb7   :  { %551 = vmatprep.subr.bf16.mxu0 %v677_v1 }
  0xba   :  { %553 = vmatpush3.bf16.msra.mxu0 %v552_v5 }
  0xbb   :  { %554 = vmatprep.subr.bf16.mxu0 %v677_v1 }
  0xbe   :  { %556 = vmatpush3.bf16.msra.mxu0 %v555_v8 }
  0xbf   :  { %557 = vmatprep.subr.bf16.mxu0 %v677_v1 }
  0xc2   :  { %559 = vmatpush3.bf16.msra.mxu0 %v558_v11 }
  0xc3   :  { %560 = vmatprep.subr.bf16.mxu0 %v677_v1 }
  0xc6   :  { %562 = vmatpush3.bf16.msra.mxu0 %v561_v14 }
  0xc9   :  { %478 = vmatmul.mubr.msk.f32.vlgmr.msra.gmra.mrb[0].mxu0 %vm56_vm2, %v680_v58 }
 0x19c   :  { %v236_v19 = vpop.f32.mrb[0].mxu0 }
 0x19d   :  { %v240_v20 = vmax.f32 %v236_v19, 0.0  ;;  %v479_v21 = vpop.f32.mrb[1].mxu0 }
 0x19f   :  { %513 = vmatmul.mubr.f32.vlgmr.msra.gmra.mrb[0].mxu1 %v240_v20 }
 0x272   :  { %v332_v23 = vpop.f32.mrb[0].mxu1 }
 0x273   :  { %v333_v1 = vadd.f32 %v358_v22, %v332_v23  ;;  %v514_v24 = vpop.f32.mrb[1].mxu1 }
 0x275   :  { %336 = vst [vmem:[#allocation8] sm:$0xff] %v333_v1 }
 0x276   :  { %655 = shalt.err (!%p652_p6)
}
 0x277   :  { %s656_s23 = scalar_lea.hbm %s786_s4, 128 }
 0x278   :  { %p657_p7 = scmp.ne.s32.totalorder %s786_s4, %s656_s23  ;;  %p660_p8 = scmp.lt.u32.totalorder %s656_s23, %s786_s4 }
 0x27a   :  { %p662_p9 = pnand %p660_p8, %p657_p7 }
 0x27c   :  { %665 = shalt.err (!%p662_p9)
}
 0x27d   :  { %346 = dma.vmem_to_hbm [thread:$0]  %s344_s19, 128, %s786_s4, [#allocation5]  }
 0x27e   :  { %670 = dma.done.wait [#allocation5], 128  }
 0x27f   :  { %671 = vsyncadd [#allocation5], 4294967168 }
 0x280   :  { %350 = vsyncpa [#allocation4], 1 }
 0x281   :  { %351 = vsyncpa [#allocation7], 1 }
 0x282   :  { %352 = vsyncpa [#allocation5], 1 }

</bundles_post_ra>
